<compile_context>
chip_gen: v7x
topology: tpu7x:2x2x1
jax: 0.10.0
libtpu: 0.0.40
codegen_flags: <defaults>
</compile_context>

<pallas_src>
import functools

import jax
import jax.numpy as jnp
from jax.experimental import pallas as pl
from jax.experimental.pallas import tpu as pltpu


def _round_up(x: int, m: int) -> int:
    return ((x + m - 1) // m) * m


def _pick_row_tile(oh_pad: int, max_tile: int = 512) -> int:
    """Largest multiple-of-32 divisor of oh_pad that is <= max_tile."""
    if oh_pad <= max_tile:
        return oh_pad
    best = 32
    d = 32
    while d <= max_tile:
        if oh_pad % d == 0:
            best = d
        d += 32
    return best


def _interp_matrix(in_size: int, out_size: int, dtype=jnp.float32):
    """Row-interpolation matrix matching PyTorch bilinear, align_corners=False.

    out = M @ in, with M of shape (out_size, in_size).
    """
    if in_size == out_size:
        return jnp.eye(out_size, dtype=dtype)
    scale = in_size / out_size
    dst = jnp.arange(out_size, dtype=jnp.float32)
    src = scale * (dst + 0.5) - 0.5
    src = jnp.maximum(src, 0.0)                      # PyTorch clamps negative src to 0
    idx0 = jnp.floor(src).astype(jnp.int32)
    idx0 = jnp.minimum(idx0, in_size - 1)
    idx1 = jnp.minimum(idx0 + 1, in_size - 1)
    lam1 = src - idx0.astype(jnp.float32)
    lam0 = 1.0 - lam1
    rows = jnp.arange(out_size)
    m = jnp.zeros((out_size, in_size), dtype=dtype)
    m = m.at[rows, idx0].add(lam0.astype(dtype))
    m = m.at[rows, idx1].add(lam1.astype(dtype))
    return m


def _rescale_threshold_kernel(idx_ref, mask_ref, rh_ref, rwt_ref, out_ref, *, mask_thr):
    """One (image, selected-mask, output-row-block) per grid step.

    idx_ref:  (num_imgs, K) int32 in SMEM -- only consumed by the index_maps
    mask_ref: (1, H, W)      raw mask logits, gathered via the prefetched index
    rh_ref:   (TOH, H)       row (height) interpolation block
    rwt_ref:  (W, OW_pad)    column (width) interpolation matrix, transposed
    out_ref:  (1, 1, TOH, OW_pad) int8 binary mask {0, 1}
    """
    del idx_ref
    m = jax.nn.sigmoid(mask_ref[0].astype(jnp.float32))                 # (H, W)
    t = jnp.dot(rh_ref[...], m, preferred_element_type=jnp.float32)     # (TOH, W)
    r = jnp.dot(t, rwt_ref[...], preferred_element_type=jnp.float32)    # (TOH, OW_pad)
    out_ref[0, 0] = (r > mask_thr).astype(jnp.int8)


def rescale_and_threshold(preds_flat, flat_indices, rh_pad, rwt_pad, *, toh, mask_thr):
    """preds_flat: (num_imgs*num_proposals, H, W); flat_indices: (num_imgs, K) int32.

    Returns (num_imgs, K, OH_pad, OW_pad) int8 in {0, 1}.
    """
    num_imgs, k = flat_indices.shape
    _, H, W = preds_flat.shape
    oh_pad = rh_pad.shape[0]
    ow_pad = rwt_pad.shape[1]
    n_oh = oh_pad // toh

    kernel = functools.partial(_rescale_threshold_kernel, mask_thr=float(mask_thr))
    cost = pl.CostEstimate(
        flops=2 * num_imgs * k * oh_pad * W * (H + ow_pad),
        transcendentals=num_imgs * k * n_oh * H * W,
        bytes_accessed=(num_imgs * k * H * W * 4          # gathered mask logits
                        + oh_pad * H * 4 + W * ow_pad * 4  # interp matrices
                        + num_imgs * k * oh_pad * ow_pad), # int8 output
    )
    grid_spec = pltpu.PrefetchScalarGridSpec(
        num_scalar_prefetch=1,
        grid=(num_imgs, k, n_oh),
        in_specs=[
            # data-dependent row gather fused into the DMA (scalar prefetch)
            pl.BlockSpec((1, H, W), lambda i, j, oh, idx: (idx[i, j], 0, 0)),
            pl.BlockSpec((toh, H), lambda i, j, oh, idx: (oh, 0)),
            pl.BlockSpec((W, ow_pad), lambda i, j, oh, idx: (0, 0)),
        ],
        out_specs=pl.BlockSpec(
            (1, 1, toh, ow_pad), lambda i, j, oh, idx: (i, j, oh, 0)
        ),
    )
    return pl.pallas_call(
        kernel,
        out_shape=jax.ShapeDtypeStruct((num_imgs, k, oh_pad, ow_pad), jnp.int8),
        grid_spec=grid_spec,
        compiler_params=pltpu.CompilerParams(
            # image / mask axes are independent -> shardable across v7x's 2 TCs
            dimension_semantics=("parallel", "parallel", "arbitrary"),
            vmem_limit_bytes=48 * 1024 * 1024,
        ),
        cost_estimate=cost,
    )(flat_indices, preds_flat, rh_pad, rwt_pad)


@functools.partial(
    jax.jit,
    static_argnames=("num_classes", "max_per_img", "mask_thr", "ori_h", "ori_w"),
)
def _forward_impl(cls_scores, scaled_mask_preds, *, num_classes, max_per_img,
                  mask_thr, ori_h, ori_w):
    num_imgs, num_proposals, _ = cls_scores.shape
    H, W = scaled_mask_preds.shape[-2:]
    K = max_per_img

    # TODO(synk): top-k + modular index arithmetic stays in XLA glue — it is
    # tiny and has no clean BlockSpec expression at these shapes.
    flat_scores = cls_scores.reshape(num_imgs, num_proposals * num_classes)
    scores, topk_idx = jax.lax.top_k(flat_scores, K)          # sorted descending
    mask_indices = topk_idx // num_classes                    # (num_imgs, K)
    labels = (topk_idx % num_classes).astype(jnp.int32)
    flat_indices = (
        mask_indices + jnp.arange(num_imgs)[:, None] * num_proposals
    ).astype(jnp.int32)

    # Padded, lane/sublane-dense interpolation matrices (pad rows/cols are
    # zero -> interpolated value 0 -> False after threshold; sliced off below).
    ow_pad = _round_up(ori_w, 128)
    oh_pad = _round_up(ori_h, 32)
    toh = _pick_row_tile(oh_pad)
    rh = _interp_matrix(H, ori_h)                             # (ori_h, H)
    rh_pad = jnp.zeros((oh_pad, H), jnp.float32).at[:ori_h, :].set(rh)
    rwt = _interp_matrix(W, ori_w).T                          # (W, ori_w)
    rwt_pad = jnp.zeros((W, ow_pad), jnp.float32).at[:, :ori_w].set(rwt)

    preds_flat = scaled_mask_preds.reshape(num_imgs * num_proposals, H, W)

    bin_pad = rescale_and_threshold(
        preds_flat, flat_indices, rh_pad, rwt_pad, toh=toh, mask_thr=mask_thr
    )
    masks = bin_pad[:, :, :ori_h, :ori_w].astype(jnp.bool_)
    return scores, masks, labels


def knet_decoder_not_do_panoptic_forward(
    cls_scores, scaled_mask_preds, *, num_classes, max_per_img, mask_thr, ori_h, ori_w
):
    """JAX/Pallas equivalent of KNetDecoderNotDoPanoptic.forward.

    cls_scores:        (num_imgs, num_proposals, num_classes)
    scaled_mask_preds: (num_imgs, num_proposals, H, W)
    Returns list of (scores (max_per_img,), masks (max_per_img, ori_h, ori_w) bool,
                     labels (max_per_img,) int32) per image.
    """
    scores, masks, labels = _forward_impl(
        cls_scores,
        scaled_mask_preds,
        num_classes=num_classes,
        max_per_img=max_per_img,
        mask_thr=float(mask_thr),
        ori_h=int(ori_h),
        ori_w=int(ori_w),
    )
    num_imgs = cls_scores.shape[0]
    return [(scores[i], masks[i], labels[i]) for i in range(num_imgs)]


if __name__ == "__main__":
    # Small deterministic example consistent with the module's forward.
    num_imgs = 2
    num_proposals = 8
    num_classes = 4
    H = W = 16
    ori_h = ori_w = 32
    max_per_img = 8
    mask_thr = 0.5

    key = jax.random.PRNGKey(0)
    k1, k2 = jax.random.split(key)
    cls_scores = jax.random.uniform(
        k1, (num_imgs, num_proposals, num_classes), dtype=jnp.float32
    )
    scaled_mask_preds = jax.random.normal(
        k2, (num_imgs, num_proposals, H, W), dtype=jnp.float32
    )

    results = knet_decoder_not_do_panoptic_forward(
        cls_scores,
        scaled_mask_preds,
        num_classes=num_classes,
        max_per_img=max_per_img,
        mask_thr=mask_thr,
        ori_h=ori_h,
        ori_w=ori_w,
    )

    for scores, masks, labels in results:
        jax.block_until_ready(scores)
        jax.block_until_ready(masks)
        jax.block_until_ready(labels)
        assert scores.shape == (max_per_img,)
        assert masks.shape == (max_per_img, ori_h, ori_w) and masks.dtype == jnp.bool_
        assert labels.shape == (max_per_img,)

    print("KERNEL_OK")
</pallas_src>

<mosaic_0001>
module attributes {stable_mosaic.version = 11 : i64} {
  func.func private @main(%arg0: i32) attributes {dimension_semantics = [#tpu.dimension_semantics<core_parallel>], iteration_bounds = array<i64: 2>, tpu.core_type = #tpu.core_type<sc_scalar_subcore>, window_params = []} {
    return
  }
}

module attributes {stable_mosaic.version = 11 : i64} {
  func.func private @main(%arg0: i32) attributes {dimension_semantics = [#tpu.dimension_semantics<core_parallel>], iteration_bounds = array<i64: 2>, tpu.core_type = #tpu.core_type<sc_scalar_subcore>, window_params = []} {
    return
  }
}

module attributes {stable_mosaic.version = 11 : i64} {
  func.func @_rescale_threshold_kernel(%arg0: i32, %arg1: i32, %arg2: i32, %arg3: memref<2x8xi32, #tpu.memory_space<smem>>, %arg4: memref<1x16x16xf32, #tpu.memory_space<vmem>>, %arg5: memref<32x16xf32, #tpu.memory_space<vmem>>, %arg6: memref<16x128xf32, #tpu.memory_space<vmem>>, %arg7: memref<1x1x32x128xi8, #tpu.memory_space<vmem>>) attributes {dimension_semantics = [#tpu.dimension_semantics<parallel>, #tpu.dimension_semantics<parallel>, #tpu.dimension_semantics<arbitrary>], iteration_bounds = array<i64: 2, 8, 1>, scalar_prefetch = 1 : i64, scratch_operands = 0 : i64, tpu.core_type = #tpu.core_type<tc>, window_params = [{transform_indices = @transform_0, window_bounds = array<i64: 1, 16, 16>}, {transform_indices = @transform_1, window_bounds = array<i64: 32, 16>}, {pipeline_mode = #tpu.pipeline_mode<synchronous>, transform_indices = @transform_2, window_bounds = array<i64: 16, 128>}, {transform_indices = @transform_3, window_bounds = array<i64: 1, 1, 32, 128>}]} {
    %c0 = arith.constant 0 : index
    %c0_0 = arith.constant 0 : index
    %c0_1 = arith.constant 0 : index
    %0 = vector.load %arg4[%c0, %c0_0, %c0_1] : memref<1x16x16xf32, #tpu.memory_space<vmem>>, vector<1x16x16xf32>
    %1 = vector.shape_cast %0 : vector<1x16x16xf32> to vector<16x16xf32>
    %2 = arith.negf %1 : vector<16x16xf32>
    %3 = math.exp %2 : vector<16x16xf32>
    %cst = arith.constant 1.000000e+00 : f32
    %4 = vector.broadcast %cst : f32 to vector<16x16xf32>
    %5 = arith.addf %4, %3 : vector<16x16xf32>
    %6 = arith.divf %4, %5 : vector<16x16xf32>
    %c0_2 = arith.constant 0 : index
    %c0_3 = arith.constant 0 : index
    %7 = vector.load %arg5[%c0_2, %c0_3] : memref<32x16xf32, #tpu.memory_space<vmem>>, vector<32x16xf32>
    %cst_4 = arith.constant dense<0.000000e+00> : vector<32x16xf32>
    %8 = tpu.matmul %7, %6, %cst_4 {dimension_numbers = #tpu.dot_dimension_numbers<[1], [0], [0], [1], [0, 0, 1, 1], [], []>} : vector<32x16xf32>, vector<16x16xf32>, vector<32x16xf32> -> vector<32x16xf32>
    %c0_5 = arith.constant 0 : index
    %c0_6 = arith.constant 0 : index
    %9 = vector.load %arg6[%c0_5, %c0_6] : memref<16x128xf32, #tpu.memory_space<vmem>>, vector<16x128xf32>
    %cst_7 = arith.constant dense<0.000000e+00> : vector<32x128xf32>
    %10 = tpu.matmul %8, %9, %cst_7 {dimension_numbers = #tpu.dot_dimension_numbers<[1], [0], [0], [1], [0, 0, 1, 1], [], []>} : vector<32x16xf32>, vector<16x128xf32>, vector<32x128xf32> -> vector<32x128xf32>
    %cst_8 = arith.constant 5.000000e-01 : f32
    %11 = vector.broadcast %cst_8 : f32 to vector<32x128xf32>
    %12 = arith.cmpf ogt, %10, %11 : vector<32x128xf32>
    %13 = arith.extui %12 : vector<32x128xi1> to vector<32x128xi8>
    %c0_9 = arith.constant 0 : index
    %c0_10 = arith.constant 0 : index
    %c0_11 = arith.constant 0 : index
    %c0_12 = arith.constant 0 : index
    %14 = vector.load %arg7[%c0_9, %c0_10, %c0_11, %c0_12] : memref<1x1x32x128xi8, #tpu.memory_space<vmem>>, vector<1x1x32x128xi8>
    %15 = vector.shape_cast %14 : vector<1x1x32x128xi8> to vector<32x128xi8>
    %16 = vector.shape_cast %13 : vector<32x128xi8> to vector<1x1x32x128xi8>
    tpu.vector_store %arg7[%c0_9, %c0_10, %c0_11, %c0_12], %16 {strides = array<i32>} : memref<1x1x32x128xi8, #tpu.memory_space<vmem>>, vector<1x1x32x128xi8>,
    return
  }
  func.func @transform_0(%arg0: i32, %arg1: i32, %arg2: i32, %arg3: memref<2x8xi32, #tpu.memory_space<smem>>) -> (i32, i32, i32) {
    %0 = arith.index_cast %arg0 : i32 to index
    %1 = arith.index_cast %arg1 : i32 to index
    %2 = memref.load %arg3[%0, %1] : memref<2x8xi32, #tpu.memory_space<smem>>
    %c0_i32 = arith.constant 0 : i32
    %c0_i32_0 = arith.constant 0 : i32
    %c0_i32_1 = arith.constant 0 : i32
    return %2, %c0_i32, %c0_i32_0 : i32, i32, i32
  }
  func.func @transform_1(%arg0: i32, %arg1: i32, %arg2: i32, %arg3: memref<2x8xi32, #tpu.memory_space<smem>>) -> (i32, i32) {
    %c0_i32 = arith.constant 0 : i32
    %c0_i32_0 = arith.constant 0 : i32
    return %arg2, %c0_i32 : i32, i32
  }
  func.func @transform_2(%arg0: i32, %arg1: i32, %arg2: i32, %arg3: memref<2x8xi32, #tpu.memory_space<smem>>) -> (i32, i32) {
    %c0_i32 = arith.constant 0 : i32
    %c0_i32_0 = arith.constant 0 : i32
    %c0_i32_1 = arith.constant 0 : i32
    return %c0_i32, %c0_i32_0 : i32, i32
  }
  func.func @transform_3(%arg0: i32, %arg1: i32, %arg2: i32, %arg3: memref<2x8xi32, #tpu.memory_space<smem>>) -> (i32, i32, i32, i32) {
    %c0_i32 = arith.constant 0 : i32
    %c0_i32_0 = arith.constant 0 : i32
    return %arg0, %arg1, %arg2, %c0_i32 : i32, i32, i32, i32
  }
}

</mosaic_0001>

<bundles_post_ra>
// kernel: _forward_impl.1
= control target key start
LH: loop header
LB: loop body
LE: loop exit
PB: predicated region body
PF: predicated region fallthrough
CT: control target
= control target key end

     0   :  { %s914_s0 = inlined_call_operand.vmem [shape: s32[2,8], index: 0, kind: input, shape index: {}]   ;;  %s915_s1 = inlined_call_operand.vmem [shape: f32[16,16,16], index: 1, kind: input, shape index: {}]   ;;  %s916_s2 = inlined_call_operand.vmem [shape: f32[32,16], index: 2, kind: input, shape index: {}]   ;;  %s917_s3 = inlined_call_operand.vmem [shape: f32[16,128], index: 3, kind: input, shape index: {}]   ;;  %s918_s4 = inlined_call_operand.vmem [shape: s8[2,8,32,128], index: 4, kind: output, shape index: {}]  }
   0x1   :  { %s9_s17 = sshll.u32 %s914_s0, 4  ;;  %s10_s17 = int_to_ptr.vmem [resolvable:$true] %s9_s17 }
   0x2   :  { %s742_s18 = scalar_lea.vmem %s10_s17, 32  ;;  %p747_p1 = scmp.lt.s32.totalorder %s10_s17, %s10_s17 }
   0x3   :  { %p743_p0 = scmp.ne.s32.totalorder %s10_s17, %s742_s18  ;;  %p748_p2 = scmp.lt.s32.totalorder %s742_s18, %s742_s18 }
   0x5   :  { %p749_p3 = por %p748_p2, %p747_p1 }
   0x7   :  { %p750_p4 = pnand %p749_p3, %p743_p0 }
   0x9   :  { %753 = shalt.err (!%p750_p4)  }
   0xa   :  { %s796_s19 = smov [#allocation3]  }
   0xb   :  { %12 = dma.vmem_to_smem %s10_s17, 32, %s796_s19, [#allocation2] }
   0xc   :  { %774 = dma.done.wait [#allocation2], 32 }
   0xd   :  { %775 = vsyncadd [#allocation2], 4294967264 }
   0xe   :  { %14 = sfence }
   0xf   :  { %s826_s20 = smov 0   ;;  %s828_s21 = smov 0  }
  0x10   :  { %s830_s22 = smov 0   ;;  %s832_s0 = smov 0  }
  0x11   :  { %s834_s23 = smov 0  }
  0x12 LB: > { %s35_s24 = sadd.s32 1, %s786_s22  ;;  %s39_s25 = sadd.s32 1, %s790_s0  ;;  %s794_s23 = sphi %s834_s23, %s20_s23   ;;  %s790_s0 = sphi %s832_s0, %s922_s0   ;;  %s786_s22 = sphi %s830_s22, %s921_s22   ;;  %s782_s21 = sphi %s828_s21, %s920_s21   ;;  %s778_s20 = sphi %s826_s20, %s919_s20  }
  0x13   : > { %p37_p5 = scmp.ge.s32.totalorder %s35_s24, 8  ;;  %p633_p6 = scmp.ge.s32.totalorder %s794_s23, 1 }
  0x14   : > { %p210_p7 = scmp.lt.s32.totalorder %s794_s23, 17 }
  0x15   : > { %s924_s24 = smov (%p37_p5, %s35_s24), 0  ;;  %s926_s25 = smov (!%p37_p5, %s39_s25), %s790_s0 }
  0x16   : > { %p211_p8 = pnand %p633_p6, %p210_p7  ;;  %p41_p9 = scmp.ge.s32.totalorder %s926_s25, 2 }
  0x17   : > { %s253_s26 = sshra.s32 (!%p211_p8), %s778_s20, 7  ;;  %s258_s27 = sand.u32 (!%p211_p8), 127, %s778_s20  ;;  %v307_v0 = vld [vmem:[%s916_s2] sm:$0xff] (!%p211_p8)  ;;  %vm311_vm0 = vcmask (!%p211_p8), 130048   ;;  %v410_v2 = vld [vmem:[%s917_s3 + $0x8] sm:$0xff] (!%p211_p8)  ;;  %v309_v16 = vld [vmem:[%s916_s2 + $0x10] sm:$0xff] (!%p211_p8) }
  0x18   : > { %s928_s25 = smov (%p41_p9, %s926_s25), 0  ;;  %214 = sbr.rel (%p211_p8) target bundleno = 509 (0x1fd), region = 32 }
  0x19   : > { %s255_s30 = sadd.s32 (!%p211_p8), %s782_s21, %s253_s26  ;;  %668 = vmatprep.mubr.msk.f32.mxu0 (!%p211_p8), %vm311_vm0, %v307_v0  ;;  %v409_v1 = vld [vmem:[%s917_s3] sm:$0xff] (!%p211_p8)  ;;  %v308_v15 = vld [vmem:[%s916_s2 + $0x8] sm:$0xff] (!%p211_p8)  ;;  %v310_v17 = vld [vmem:[%s916_s2 + $0x18] sm:$0xff] (!%p211_p8)  ;;  %p280_p11 = scmp.lt.s32.totalorder (!%p211_p8), %s782_s21, 1  ;;  %v797_v26 = vmov (!%p211_p8), 0  }
  0x1a   : > { %s634_s9 = sshll.u32 (!%p211_p8), %s255_s30, 7  ;;  %v688_v3 = vpack.c.bf16 (!%p211_p8), %v410_v2, %v409_v1  ;;  %p282_p12 = scmp.lt.s32.totalorder (!%p211_p8), %s778_s20, 7 }
  0x1b   : > { %s259_s10 = sadd.s32 (!%p211_p8), %s634_s9, %s258_s27 }
  0x1c   : > { %s260_s11 = sld [smem:[#allocation3 + %s259_s10]] (!%p211_p8)  ;;  %689 = vmatprep.subr.bf16.mxu1 (!%p211_p8), %v688_v3 }
  0x1d   : > { %691 = vmatpush3.bf16.msra.mxu1 (!%p211_p8), %v688_v3 }
  0x1f   : > { %s932_s21 = smov (!%p280_p11, %s782_s21), 1  ;;  %s934_s20 = smov (!%p282_p12, %s778_s20), 7 }
  0x20   : > { %s637_s28 = sshll.u32 %s932_s21, 3 }
  0x21   : > { %s288_s29 = sadd.s32 %s637_s28, %s934_s20 }
  0x22   : > { %p261_p10 = scmp.lt.s32.totalorder %s260_s11, 15  ;;  %s638_s30 = sshll.u32 %s288_s29, 3 }
  0x23   : > { %s290_s7 = scalar_lea.vmem %s918_s4, %s638_s30 }
  0x24   : > { %s930_s11 = smov (!%p261_p10, %s260_s11), 15 }
  0x25   : > { %s651_s12 = sshll.u32 %s930_s11, 4 }
  0x26   : > { %s265_s15 = scalar_lea.vmem %s915_s1, %s651_s12 }
  0x27   : > { %v293_v4 = vld [vmem:[%s265_s15] sm:$0xff]  ;;  %v294_v5 = vld [vmem:[%s265_s15 + $0x8] sm:$0xff] }
  0x28   : > { %v639_v6 = vmul.f32 -1.442695, %v293_v4  ;;  %v640_v7 = vmul.f32 -1.442695, %v294_v5 }
  0x2a   : > { %734 = vpow2.f32 %v639_v6 }
  0x2b   : > { %736 = vpow2.f32 %v640_v7 }
  0x34   : > { %v735_v8 = vpop.eup %734 }
  0x35   : > { %v737_v9 = vpop.eup %736  ;;  %v301_v10 = vadd.f32 1.0, %v735_v8 }
  0x36   : > { %v302_v11 = vadd.f32 1.0, %v737_v9 }
  0x37   : > { %738 = vrcp.f32 %v301_v10 }
  0x38   : > { %740 = vrcp.f32 %v302_v11 }
  0x41   : > { %v739_v12 = vpop.eup %738 }
  0x42   : > { %v741_v13 = vpop.eup %740 }
  0x43   : > { %v684_v14 = vpack.c.bf16 %v741_v13, %v739_v12 }
  0x45   : > { %685 = vmatprep.subr.bf16.mxu0 %v684_v14 }
  0x46   : > { %687 = vmatpush3.bf16.msra.mxu0 %v684_v14 }
  0x49   : > { %669 = vmatmul.mubr.msk.f32.vlgmr.msra.gmra.mrb[0].mxu0 %vm311_vm0, %v308_v15 }
  0x4a   : > { %671 = vmatprep.mubr.msk.f32.mxu0 %vm311_vm0, %v309_v16 }
  0x4d   : > { %672 = vmatmul.mubr.msk.f32.gmra.mrb[2].mxu0 %vm311_vm0, %v310_v17 }
 0x11c   : > { %v670_v18 = vpop.f32.mrb[0].mxu0 }
 0x11d   : > { %v390_v19 = vpop.f32.mrb[1].mxu0 }
 0x11e   : > { %678 = vmatprep.mubr.msk.f32.mxu1 %vm311_vm0, %v390_v19 }
 0x11f   : > { %679 = vmatmul.mubr.msk.f32.vlgmr.msra.gmra.mrb[0].mxu1 %vm311_vm0, %v670_v18 }
 0x120   : > { %v673_v20 = vpop.f32.mrb[2].mxu0 }
 0x121   : > { %v400_v21 = vpop.f32.mrb[3].mxu0 }
 0x122   : > { %681 = vmatprep.mubr.msk.f32.mxu1 %vm311_vm0, %v400_v21 }
 0x123   : > { %682 = vmatmul.mubr.msk.f32.gmra.mrb[2].mxu1 %vm311_vm0, %v673_v20 }
 0x1f2   : > { %v680_v22 = vpop.f32.mrb[0].mxu1 }
 0x1f3   : > { %vm509_vm1 = vcmp.gt.f32.partialorder %v680_v22, 0.5  ;;  %v489_v23 = vpop.f32.mrb[1].mxu1 }
 0x1f4   : > { %vm508_vm2 = vcmp.gt.f32.partialorder %v489_v23, 0.5 }
 0x1f5   : > { %vm512_vm3 = vmpackc.low %vm509_vm1, %vm508_vm2 }
 0x1f6   : > { %v683_v24 = vpop.f32.mrb[2].mxu1 }
 0x1f7   : > { %vm511_vm4 = vcmp.gt.f32.partialorder %v683_v24, 0.5  ;;  %v499_v25 = vpop.f32.mrb[3].mxu1 }
 0x1f8   : > { %vm510_vm5 = vcmp.gt.f32.partialorder %v499_v25, 0.5 }
 0x1f9   : > { %vm513_vm6 = vmpackc.low %vm511_vm4, %vm510_vm5 }
 0x1fa   : > { %vm514_vm7 = vmpackc.even %vm513_vm6, %vm512_vm3 }
 0x1fb   : > { %v515_v27 = vsel %vm514_vm7, 16843009, %v797_v26 }
 0x1fc   : > { %516 = vst [vmem:[%s290_s7] sm:$0xff] %v515_v27 }
 0x1fd PF: > { %s20_s23 = sadd.s32 1, %s794_s23   ;;  %s919_s20 = smov %s786_s22 }
 0x1fe   : > { %p17_p13 = scmp.ge.s32.totalorder %s20_s23, 18   ;;  %s920_s21 = smov %s790_s0 }
 0x1ff   : > { %s921_s22 = smov %s924_s24  ;;  %s922_s0 = smov %s928_s25 }
 0x200   :  { %19 = sbr.rel (!%p17_p13) target bundleno = 18 (0x12), region = 65 }

</bundles_post_ra>
